<compile_context>
chip_gen: v7x
topology: tpu7x:2x2x1
jax: 0.10.0
libtpu: 0.0.40
codegen_flags: <defaults>
</compile_context>

<pallas_src>
import functools

import jax
import jax.numpy as jnp
from jax import lax
from jax.experimental import pallas as pl
from jax.experimental.pallas import tpu as pltpu


def _round_up(n, m):
    return ((n + m - 1) // m) * m


def _logreg_kernel(x_ref, w_ref, b_ref, o_ref):
    # (TB, D) x (O_pad, D) -> (TB, O_pad): contract dim 1 of x with dim 1 of W
    # so the PyTorch-layout weight is consumed untransposed by the MXU.
    logits = lax.dot_general(
        x_ref[...],
        w_ref[...],
        dimension_numbers=(((1,), (1,)), ((), ())),
        preferred_element_type=jnp.float32,
    )
    # Bias add + sigmoid stay in f32 (VPU/EUP epilogue), downcast only at store.
    o_ref[...] = jax.nn.sigmoid(logits + b_ref[...]).astype(o_ref.dtype)


@functools.partial(jax.jit, static_argnames=("block_b", "use_bf16"))
def logistic_regression_forward(x, weight, bias, *, block_b=256, use_bf16=False):
    """x: (B, D) f32, weight: (O, D) f32 (PyTorch nn.Linear layout), bias: (O,) f32."""
    B, D = x.shape
    O = weight.shape[0]

    # Lane-dense output: pad the output-feature axis to a multiple of 128.
    O_pad = _round_up(max(O, 128), 128)
    # Batch tile: multiple of 8 sublanes, capped at block_b; pad B to a multiple.
    TB = min(_round_up(B, 8), _round_up(block_b, 8))
    B_pad = _round_up(B, TB)

    w_p = jnp.pad(weight, ((0, O_pad - O), (0, 0)))          # (O_pad, D)
    b_p = jnp.pad(bias, (0, O_pad - O)).reshape(1, O_pad)    # (1, O_pad), f32
    x_p = jnp.pad(x, ((0, B_pad - B), (0, 0)))               # (B_pad, D)

    if use_bf16:
        # Halves W/x HBM traffic and hits bf16 MXU peak on v6e/v7x;
        # accumulation stays f32 via preferred_element_type.
        x_p = x_p.astype(jnp.bfloat16)
        w_p = w_p.astype(jnp.bfloat16)

    grid = (B_pad // TB,)

    out = pl.pallas_call(
        _logreg_kernel,
        out_shape=jax.ShapeDtypeStruct((B_pad, O_pad), jnp.float32),
        grid_spec=pltpu.PrefetchScalarGridSpec(
            num_scalar_prefetch=0,
            grid=grid,
            in_specs=[
                # x: tiled over the batch grid axis (double-buffered DMA).
                pl.BlockSpec((TB, D), lambda i: (i, 0)),
                # W, bias: resident in VMEM across all batch tiles.
                pl.BlockSpec((O_pad, D), lambda i: (0, 0)),
                pl.BlockSpec((1, O_pad), lambda i: (0, 0)),
            ],
            out_specs=pl.BlockSpec((TB, O_pad), lambda i: (i, 0)),
        ),
        compiler_params=pltpu.CompilerParams(
            # Batch tiles are independent -> shard across TCs on v7x.
            dimension_semantics=("parallel",),
        ),
    )(x_p, w_p, b_p)

    # Strip batch / output-feature padding.
    return out[:B, :O]


if __name__ == "__main__":
    key = jax.random.PRNGKey(0)
    k_x, k_w, k_b = jax.random.split(key, 3)

    # Small shapes consistent with the module: input_dim=32, output_dim=16, batch=8.
    B, D, O = 8, 32, 16

    x = jax.random.normal(k_x, (B, D), dtype=jnp.float32)
    # Deterministic parameter init (mimic nn.Linear uniform(-1/sqrt(D), 1/sqrt(D))).
    bound = 1.0 / (D ** 0.5)
    weight = jax.random.uniform(k_w, (O, D), minval=-bound, maxval=bound, dtype=jnp.float32)
    bias = jax.random.uniform(k_b, (O,), minval=-bound, maxval=bound, dtype=jnp.float32)

    out = logistic_regression_forward(x, weight, bias)
    out = jax.block_until_ready(out)

    # Correctness check against pure-JAX reference (f32 path => tight tolerance).
    ref = jax.nn.sigmoid(x @ weight.T + bias)
    assert out.shape == (B, O)
    assert jnp.allclose(out, ref, atol=1e-5, rtol=1e-5)

    print("KERNEL_OK")
</pallas_src>

<mosaic_0001>
module attributes {stable_mosaic.version = 11 : i64} {
  func.func @_logreg_kernel(%arg0: i32, %arg1: memref<8x32xf32, #tpu.memory_space<vmem>>, %arg2: memref<128x32xf32, #tpu.memory_space<vmem>>, %arg3: memref<1x128xf32, #tpu.memory_space<vmem>>, %arg4: memref<8x128xf32, #tpu.memory_space<vmem>>) attributes {dimension_semantics = [#tpu.dimension_semantics<parallel>], iteration_bounds = array<i64: 1>, scalar_prefetch = 0 : i64, scratch_operands = 0 : i64, tpu.core_type = #tpu.core_type<tc>, window_params = [{transform_indices = @transform_0, window_bounds = array<i64: 8, 32>}, {pipeline_mode = #tpu.pipeline_mode<synchronous>, transform_indices = @transform_1, window_bounds = array<i64: 128, 32>}, {pipeline_mode = #tpu.pipeline_mode<synchronous>, transform_indices = @transform_2, window_bounds = array<i64: 1, 128>}, {transform_indices = @transform_3, window_bounds = array<i64: 8, 128>}]} {
    %c0 = arith.constant 0 : index
    %c0_0 = arith.constant 0 : index
    %0 = vector.load %arg1[%c0, %c0_0] : memref<8x32xf32, #tpu.memory_space<vmem>>, vector<8x32xf32>
    %c0_1 = arith.constant 0 : index
    %c0_2 = arith.constant 0 : index
    %1 = vector.load %arg2[%c0_1, %c0_2] : memref<128x32xf32, #tpu.memory_space<vmem>>, vector<128x32xf32>
    %cst = arith.constant dense<0.000000e+00> : vector<8x128xf32>
    %2 = tpu.matmul %0, %1, %cst {dimension_numbers = #tpu.dot_dimension_numbers<[1], [1], [0], [0], [0, 0, 1, 0], [], []>} : vector<8x32xf32>, vector<128x32xf32>, vector<8x128xf32> -> vector<8x128xf32>
    %c0_3 = arith.constant 0 : index
    %c0_4 = arith.constant 0 : index
    %3 = vector.load %arg3[%c0_3, %c0_4] : memref<1x128xf32, #tpu.memory_space<vmem>>, vector<1x128xf32>
    %4 = vector.broadcast %3 : vector<1x128xf32> to vector<8x128xf32>
    %5 = arith.addf %2, %4 : vector<8x128xf32>
    %6 = arith.negf %5 : vector<8x128xf32>
    %7 = math.exp %6 : vector<8x128xf32>
    %cst_5 = arith.constant 1.000000e+00 : f32
    %8 = vector.broadcast %cst_5 : f32 to vector<8x128xf32>
    %9 = arith.addf %8, %7 : vector<8x128xf32>
    %10 = arith.divf %8, %9 : vector<8x128xf32>
    %c0_6 = arith.constant 0 : index
    %c0_7 = arith.constant 0 : index
    %11 = vector.load %arg4[%c0_6, %c0_7] : memref<8x128xf32, #tpu.memory_space<vmem>>, vector<8x128xf32>
    tpu.vector_store %arg4[%c0_6, %c0_7], %10 {strides = array<i32>} : memref<8x128xf32, #tpu.memory_space<vmem>>, vector<8x128xf32>,
    return
  }
  func.func @transform_0(%arg0: i32) -> (i32, i32) {
    %c0_i32 = arith.constant 0 : i32
    %c0_i32_0 = arith.constant 0 : i32
    return %arg0, %c0_i32 : i32, i32
  }
  func.func @transform_1(%arg0: i32) -> (i32, i32) {
    %c0_i32 = arith.constant 0 : i32
    %c0_i32_0 = arith.constant 0 : i32
    %c0_i32_1 = arith.constant 0 : i32
    return %c0_i32, %c0_i32_0 : i32, i32
  }
  func.func @transform_2(%arg0: i32) -> (i32, i32) {
    %c0_i32 = arith.constant 0 : i32
    %c0_i32_0 = arith.constant 0 : i32
    %c0_i32_1 = arith.constant 0 : i32
    return %c0_i32, %c0_i32_0 : i32, i32
  }
  func.func @transform_3(%arg0: i32) -> (i32, i32) {
    %c0_i32 = arith.constant 0 : i32
    %c0_i32_0 = arith.constant 0 : i32
    return %arg0, %c0_i32 : i32, i32
  }
}

</mosaic_0001>

<bundles_post_ra>
// kernel: logistic_regression_forward.1
= control target key start
LH: loop header
LB: loop body
LE: loop exit
PB: predicated region body
PF: predicated region fallthrough
CT: control target
= control target key end

     0   :  { %vm39_vm0 = vcmask 261120   ;;  %v317_v2 = vmov 0.0|0.0   ;;  %vm318_vm2 = vmmov 0   ;;  %v319_v5 = vmov 0.0   ;;  %s430_s0 = inlined_call_operand.vmem [shape: f32[8,32], index: 0, kind: input, shape index: {}]   ;;  %s431_s1 = inlined_call_operand.vmem [shape: f32[128,32], index: 1, kind: input, shape index: {}]   ;;  %s432_s2 = inlined_call_operand.vmem [shape: f32[1,128], index: 2, kind: input, shape index: {}]   ;;  %s433_s3 = inlined_call_operand.hbm [shape: f32[8,128], index: 3, kind: output, shape index: {}]  }
   0x1   :  { %v16_v0 = vld [vmem:[%s431_s1] sm:$0xff]  ;;  %v17_v1 = vld [vmem:[%s431_s1 + $0x8] sm:$0xff]  ;;  %253 = vmatprep.subr.bf16.mxu0 %v317_v2  ;;  %vm349_vm1 = vmpackc.low %vm39_vm0, %vm39_vm0  ;;  %250 = vmatprep.mubr.msk.f32.mxu0 %vm318_vm2, %v319_v5 }
   0x2   :  { %v254_v3 = vpack.c.bf16 %v17_v1, %v16_v0  ;;  %v18_v6 = vld [vmem:[%s431_s1 + $0x10] sm:$0xff]  ;;  %v19_v7 = vld [vmem:[%s431_s1 + $0x18] sm:$0xff] }
   0x4   :  { %256 = vmatpush3.bf16.xpose.msk.msra.mxu0 %vm349_vm1, %v254_v3 }
   0x5   :  { %257 = vmatprep.subr.bf16.mxu0 %v317_v2 }
   0x6   :  { %8 = vsyncpa [#allocation3], 0  ;;  %v258_v8 = vpack.c.bf16 %v19_v7, %v18_v6  ;;  %v20_v9 = vld [vmem:[%s431_s1 + $0x20] sm:$0xff]  ;;  %v21_v10 = vld [vmem:[%s431_s1 + $0x28] sm:$0xff] }
   0x7   :  { %v262_v11 = vpack.c.bf16 %v21_v10, %v20_v9  ;;  %v22_v12 = vld [vmem:[%s431_s1 + $0x30] sm:$0xff]  ;;  %v23_v13 = vld [vmem:[%s431_s1 + $0x38] sm:$0xff]  ;;  %v24_v15 = vld [vmem:[%s431_s1 + $0x40] sm:$0xff] }
   0x8   :  { %v266_v14 = vpack.c.bf16 %v23_v13, %v22_v12  ;;  %v25_v16 = vld [vmem:[%s431_s1 + $0x48] sm:$0xff]  ;;  %v26_v18 = vld [vmem:[%s431_s1 + $0x50] sm:$0xff]  ;;  %v27_v19 = vld [vmem:[%s431_s1 + $0x58] sm:$0xff] }
   0x9   :  { %v270_v17 = vpack.c.bf16 %v25_v16, %v24_v15  ;;  %v274_v20 = vpack.c.bf16 %v27_v19, %v26_v18  ;;  %v28_v21 = vld [vmem:[%s431_s1 + $0x60] sm:$0xff]  ;;  %v29_v22 = vld [vmem:[%s431_s1 + $0x68] sm:$0xff]  ;;  %v30_v24 = vld [vmem:[%s431_s1 + $0x70] sm:$0xff] }
   0xa   :  { %v278_v23 = vpack.c.bf16 %v29_v22, %v28_v21  ;;  %v31_v25 = vld [vmem:[%s431_s1 + $0x78] sm:$0xff]  ;;  %v15_v27 = vld [vmem:[%s430_s0] sm:$0xff]  ;;  %s320_s1 = smov [#allocation2]  }
   0xb   :  { %v282_v26 = vpack.c.bf16 %v31_v25, %v30_v24  ;;  %v182_v28 = vld [vmem:[%s432_s2] ss:$0 sm:$0xff]  ;;  %s174_s21 = sshll.u32 %s320_s1, 4  ;;  %s175_s21 = int_to_ptr.vmem [resolvable:$true] %s174_s21 }
   0xc   :  { %260 = vmatpush3.bf16.xpose.msk.msra.mxu0 %vm349_vm1, %v258_v8  ;;  %s293_s0 = scalar_lea.vmem %s175_s21, 128  ;;  %p298_p1 = scmp.lt.s32.totalorder %s175_s21, %s175_s21 }
   0xd   :  { %261 = vmatprep.subr.bf16.mxu0 %v317_v2  ;;  %p294_p0 = scmp.ne.s32.totalorder %s175_s21, %s293_s0  ;;  %p299_p2 = scmp.lt.s32.totalorder %s293_s0, %s293_s0 }
   0xf   :  { %p300_p3 = por %p299_p2, %p298_p1 }
  0x11   :  { %p301_p4 = pnand %p300_p3, %p294_p0 }
  0x14   :  { %264 = vmatpush3.bf16.xpose.msk.msra.mxu0 %vm349_vm1, %v262_v11 }
  0x15   :  { %265 = vmatprep.subr.bf16.mxu0 %v317_v2 }
  0x1c   :  { %268 = vmatpush3.bf16.xpose.msk.msra.mxu0 %vm349_vm1, %v266_v14 }
  0x1d   :  { %269 = vmatprep.subr.bf16.mxu0 %v317_v2 }
  0x24   :  { %272 = vmatpush3.bf16.xpose.msk.msra.mxu0 %vm349_vm1, %v270_v17 }
  0x25   :  { %273 = vmatprep.subr.bf16.mxu0 %v317_v2 }
  0x2c   :  { %276 = vmatpush3.bf16.xpose.msk.msra.mxu0 %vm349_vm1, %v274_v20 }
  0x2d   :  { %277 = vmatprep.subr.bf16.mxu0 %v317_v2 }
  0x34   :  { %280 = vmatpush3.bf16.xpose.msk.msra.mxu0 %vm349_vm1, %v278_v23 }
  0x35   :  { %281 = vmatprep.subr.bf16.mxu0 %v317_v2 }
  0x3c   :  { %284 = vmatpush3.bf16.xpose.msk.msra.mxu0 %vm349_vm1, %v282_v26 }
  0x43   :  { %251 = vmatmul.mubr.msk.f32.vlgmr.msra.gmra.mrb[0].mxu0 %vm39_vm0, %v15_v27 }
 0x116   :  { %v157_v29 = vpop.f32.mrb[0].mxu0 }
 0x117   :  { %v158_v30 = vadd.f32 %v182_v28, %v157_v29  ;;  %v252_v31 = vpop.f32.mrb[1].mxu0 }
 0x119   :  { %v200_v32 = vmul.f32 -1.442695, %v158_v30 }
 0x11b   :  { %289 = vpow2.f32 %v200_v32 }
 0x125   :  { %v290_v33 = vpop.eup %289 }
 0x126   :  { %v164_v34 = vadd.f32 1.0, %v290_v33 }
 0x128   :  { %291 = vrcp.f32 %v164_v34 }
 0x132   :  { %v292_v35 = vpop.eup %291 }
 0x133   :  { %167 = vst [vmem:[#allocation2] sm:$0xff] %v292_v35 }
 0x134   :  { %304 = shalt.err (!%p301_p4)
}
 0x135   :  { %s305_s23 = scalar_lea.hbm %s433_s3, 128 }
 0x136   :  { %p306_p5 = scmp.ne.s32.totalorder %s433_s3, %s305_s23  ;;  %p309_p6 = scmp.lt.u32.totalorder %s305_s23, %s433_s3 }
 0x138   :  { %p311_p7 = pnand %p309_p6, %p306_p5 }
 0x13a   :  { %314 = shalt.err (!%p311_p7)
}
 0x13b   :  { %177 = dma.vmem_to_hbm [thread:$0]  %s175_s21, 128, %s433_s3, [#allocation3]  }
 0x13c   :  { %315 = dma.done.wait [#allocation3], 128  }
 0x13d   :  { %316 = vsyncadd [#allocation3], 4294967168 }
 0x13e   :  { %181 = vsyncpa [#allocation3], 1 }

</bundles_post_ra>
